<compile_context>
chip_gen: v7x
topology: tpu7x:2x2x1
jax: 0.10.0
libtpu: 0.0.40
codegen_flags: <defaults>
</compile_context>

<pallas_src>
import functools
import math

import jax
import jax.numpy as jnp
from jax import lax
from jax.experimental import pallas as pl
from jax.experimental.pallas import tpu as pltpu

_LANE = 128
_SUB = 8


# --------------------------------------------------------------------------- #
# Kernel
# --------------------------------------------------------------------------- #
def _bce_kernel(p_ref, t_ref, o_ref, *, rows_valid, needs_mask):
    c = pl.program_id(0)          # parallel chunk (v7x: one per TensorCore)
    k = pl.program_id(1)          # reduction step within the chunk
    nsteps = pl.num_programs(1)

    @pl.when(k == 0)
    def _():
        o_ref[...] = jnp.zeros_like(o_ref)

    p = p_ref[...].astype(jnp.float32)
    t = t_ref[...].astype(jnp.float32)

    if needs_mask:
        blk = p_ref.shape[0]
        # Logical (unclamped) row offset of this step; phantom (clamped) and
        # ragged blocks fall entirely / partially past rows_valid.
        offset = (c * nsteps + k) * blk
        pos = lax.broadcasted_iota(jnp.int32, p_ref.shape, 0) + offset
        valid = pos < rows_valid
        # Sanitize so garbage from partial / phantom blocks never reaches log().
        p = jnp.where(valid, p, 0.5)
        t = jnp.where(valid, t, 0.5)

    # PyTorch BCELoss clamps the log terms at -100 for numerical stability.
    log_p = jnp.maximum(jnp.log(p), -100.0)
    log_1mp = jnp.maximum(jnp.log1p(-p), -100.0)
    # == -(t*log_p + (1-t)*log_1mp), one fewer mul and no (1-t) materialization.
    loss = -(log_1mp + t * (log_p - log_1mp))

    if needs_mask:
        loss = jnp.where(valid, loss, 0.0)

    # Free row-major view (blk,128) -> (blk//8, 8, 128); axis-0 sum is pure VPU
    # vreg adds.  o_ref (8,128) stays resident across the reduction axis.
    o_ref[...] += loss.reshape(-1, _SUB, _LANE).sum(axis=0)


# --------------------------------------------------------------------------- #
# Helpers
# --------------------------------------------------------------------------- #
def _bce_elementwise(p, t):
    p = p.astype(jnp.float32)
    t = t.astype(jnp.float32)
    log_p = jnp.maximum(jnp.log(p), -100.0)
    log_1mp = jnp.maximum(jnp.log1p(-p), -100.0)
    return -(log_1mp + t * (log_p - log_1mp))


def bce_loss_ref(pred, target):
    """Plain-JAX reference (identical math, single fused reduction)."""
    return jnp.mean(_bce_elementwise(pred.reshape(-1), target.reshape(-1)))


def _chip_config():
    """(per-input block bytes, #TensorCores, vmem_limit_bytes or None)."""
    kind = ""
    try:
        kind = jax.devices()[0].device_kind.lower()
    except Exception:
        pass
    vmem_phys = None
    try:
        vmem_phys = pltpu.get_tpu_info().vmem_capacity_bytes
    except Exception:
        pass
    if "v7" in kind or (vmem_phys is not None and vmem_phys <= (64 << 20)):
        # v7x: 2 TCs, ~3.2 TB/s HBM, 64 MiB physical VMEM.  8 MiB/input block
        # -> 32 MiB double-buffered, needs an explicit scoped-VMEM raise.
        return {"block_bytes": 8 << 20, "num_tcs": 2, "vmem_limit": 40 << 20}
    if "v6" in kind:
        # v6e: 4 MiB/input -> 16 MiB double-buffered, fits 32 MiB default.
        return {"block_bytes": 4 << 20, "num_tcs": 1, "vmem_limit": None}
    # v5e / unknown: 2 MiB/input -> 8 MiB, well under the 16 MiB default.
    return {"block_bytes": 2 << 20, "num_tcs": 1, "vmem_limit": None}


def _pick_num_chunks(nblocks, num_tcs):
    if nblocks < 2:
        return 1
    if num_tcs >= 2:
        # One clamped+masked phantom block is far cheaper than an idle TC.
        return 2
    # 1-TC chips: only split when it costs nothing (no phantom) or is tiny
    # relative to the work.
    if nblocks % 2 == 0 or nblocks >= 9:
        return 2
    return 1


# --------------------------------------------------------------------------- #
# Wrapper
# --------------------------------------------------------------------------- #
def bce_loss(pred, target, *, block_rows=None, min_pallas_elems=1 << 17):
    """Mean binary cross-entropy over all elements (nn.BCELoss, size_average=True).

    Accepts any float dtype (bf16 recommended on HBM-bound chips; the kernel
    upcasts to f32 in-register).
    """
    assert pred.shape == target.shape
    total = int(math.prod(pred.shape)) if pred.shape else 1

    # Tiny inputs: pallas_call / DMA setup overhead dwarfs the compute.
    if total < max(int(min_pallas_elems), _SUB * _LANE):
        return bce_loss_ref(pred, target)

    flat_p = pred.reshape(-1)
    flat_t = target.reshape(-1)
    rem = total % _LANE
    main = total - rem
    rows = main // _LANE

    if rem:
        # Fully-packed bulk through Pallas, <128-element ragged tail in JAX.
        p2 = flat_p[:main].reshape(rows, _LANE)
        t2 = flat_t[:main].reshape(rows, _LANE)
        tail_sum = jnp.sum(_bce_elementwise(flat_p[main:], flat_t[main:]))
    else:
        # Free row-major view -> full (8,128) vreg packing for any batch size.
        p2 = flat_p.reshape(rows, _LANE)
        t2 = flat_t.reshape(rows, _LANE)
        tail_sum = None

    cfg = _chip_config()
    if block_rows is None:
        itemsize = max(jnp.dtype(pred.dtype).itemsize,
                       jnp.dtype(target.dtype).itemsize)
        block_rows = cfg["block_bytes"] // (_LANE * itemsize)
    block_rows = max(_SUB, (int(block_rows) // _SUB) * _SUB)
    blk = min(block_rows, (rows // _SUB) * _SUB)     # multiple of 8, >= 8
    nblocks = pl.cdiv(rows, blk)

    num_chunks = _pick_num_chunks(nblocks, cfg["num_tcs"])
    steps = pl.cdiv(nblocks, num_chunks)
    # Mask needed if the tiling is ragged or a phantom (clamped) block exists.
    needs_mask = (num_chunks * steps * blk) != rows

    in_map = lambda c, k: (jnp.minimum(c * steps + k, nblocks - 1), 0)

    kernel = functools.partial(_bce_kernel, rows_valid=rows,
                               needs_mask=needs_mask)

    in_itemsize = (jnp.dtype(pred.dtype).itemsize
                   + jnp.dtype(target.dtype).itemsize)
    cost = pl.CostEstimate(
        flops=7 * total,
        transcendentals=2 * total,
        bytes_accessed=in_itemsize * total + 4 * num_chunks * _SUB * _LANE,
    )

    comp_kwargs = {"dimension_semantics": ("parallel", "arbitrary")}
    if cfg["vmem_limit"] is not None:
        comp_kwargs["vmem_limit_bytes"] = cfg["vmem_limit"]

    # TODO(synk): if an xprof trace on v7x still shows exposed input DMA at
    # short step times, add pipeline_mode=pl.Buffered(3) to the input specs.
    partial = pl.pallas_call(
        kernel,
        out_shape=jax.ShapeDtypeStruct((num_chunks * _SUB, _LANE), jnp.float32),
        grid_spec=pltpu.PrefetchScalarGridSpec(
            num_scalar_prefetch=0,
            grid=(num_chunks, steps),
            in_specs=[
                pl.BlockSpec((blk, _LANE), in_map),
                pl.BlockSpec((blk, _LANE), in_map),
            ],
            out_specs=pl.BlockSpec((_SUB, _LANE), lambda c, k: (c, 0)),
        ),
        compiler_params=pltpu.CompilerParams(**comp_kwargs),
        cost_estimate=cost,
    )(p2, t2)

    loss_sum = jnp.sum(partial)
    if tail_sum is not None:
        loss_sum = loss_sum + tail_sum
    return loss_sum / jnp.float32(total)


# --------------------------------------------------------------------------- #
# Self-test
# --------------------------------------------------------------------------- #
if __name__ == "__main__":
    key = jax.random.PRNGKey(0)
    keys = jax.random.split(key, 4)

    def make(shape, k, dtype=jnp.float32):
        ka, kb = jax.random.split(k)
        pred = jax.nn.sigmoid(jax.random.normal(ka, shape, dtype=jnp.float32))
        target = (jax.random.uniform(kb, shape) > 0.5).astype(jnp.float32)
        return pred.astype(dtype), target.astype(dtype)

    def check(loss, ref, tol=1e-4):
        loss = jax.block_until_ready(loss)
        assert jnp.allclose(loss, ref, rtol=tol, atol=1e-6), (loss, ref)

    # 1) Module-implied shape (NCHW: batch=2, channels=4, 16x16), forced
    #    through the Pallas path (single fully-packed (16,128) block).
    pred, target = make((2, 4, 16, 16), keys[0])
    check(bce_loss(pred, target, min_pallas_elems=0), bce_loss_ref(pred, target))

    # 2) Same inputs via the default small-input short-circuit (plain JAX).
    check(bce_loss(pred, target), bce_loss_ref(pred, target))

    # 3) Multi-block path: tiny block_rows -> 9 blocks, 2 parallel chunks,
    #    a ragged (masked) last block and a phantom (clamped+masked) block.
    pred, target = make((2, 4, 32, 34), keys[1])
    check(bce_loss(pred, target, block_rows=8, min_pallas_elems=0),
          bce_loss_ref(pred, target))

    # 4) total % 128 != 0 fallback: fully-packed bulk + plain-JAX ragged tail.
    pred, target = make((3, 5, 7, 11), keys[2])
    check(bce_loss(pred, target, min_pallas_elems=0), bce_loss_ref(pred, target))

    # 5) bf16 inputs (halves HBM traffic; kernel upcasts in-register).
    pred, target = make((2, 4, 64, 64), keys[3], dtype=jnp.bfloat16)
    check(bce_loss(pred, target, min_pallas_elems=0),
          bce_loss_ref(pred, target), tol=2e-3)

    print("KERNEL_OK")
</pallas_src>

<mosaic_0001>
module attributes {stable_mosaic.version = 11 : i64} {
  func.func @_bce_kernel(%arg0: i32, %arg1: i32, %arg2: memref<16x128xf32, #tpu.memory_space<vmem>>, %arg3: memref<16x128xf32, #tpu.memory_space<vmem>>, %arg4: memref<8x128xf32, #tpu.memory_space<vmem>>) attributes {dimension_semantics = [#tpu.dimension_semantics<parallel>, #tpu.dimension_semantics<arbitrary>], iteration_bounds = array<i64: 1, 1>, scalar_prefetch = 0 : i64, scratch_operands = 0 : i64, tpu.core_type = #tpu.core_type<tc>, window_params = [{transform_indices = @transform_0, window_bounds = array<i64: 16, 128>}, {transform_indices = @transform_1, window_bounds = array<i64: 16, 128>}, {transform_indices = @transform_2, window_bounds = array<i64: 8, 128>}]} {
    %c0_i32 = arith.constant 0 : i32
    %0 = arith.cmpi eq, %arg1, %c0_i32 : i32
    %1 = arith.extui %0 : i1 to i32
    %c0_i32_0 = arith.constant 0 : i32
    %2 = arith.cmpi ne, %1, %c0_i32_0 : i32
    scf.if %2 {
      %cst_12 = arith.constant 0.000000e+00 : f32
      %23 = vector.broadcast %cst_12 : f32 to vector<8x128xf32>
      %c0_13 = arith.constant 0 : index
      %c0_14 = arith.constant 0 : index
      %24 = vector.load %arg4[%c0_13, %c0_14] : memref<8x128xf32, #tpu.memory_space<vmem>>, vector<8x128xf32>
      tpu.vector_store %arg4[%c0_13, %c0_14], %23 {strides = array<i32>} : memref<8x128xf32, #tpu.memory_space<vmem>>, vector<8x128xf32>,
    } else {
    }
    %c0 = arith.constant 0 : index
    %c0_1 = arith.constant 0 : index
    %3 = vector.load %arg2[%c0, %c0_1] : memref<16x128xf32, #tpu.memory_space<vmem>>, vector<16x128xf32>
    %c0_2 = arith.constant 0 : index
    %c0_3 = arith.constant 0 : index
    %4 = vector.load %arg3[%c0_2, %c0_3] : memref<16x128xf32, #tpu.memory_space<vmem>>, vector<16x128xf32>
    %5 = math.log %3 : vector<16x128xf32>
    %cst = arith.constant -1.000000e+02 : f32
    %6 = vector.broadcast %cst : f32 to vector<16x128xf32>
    %7 = arith.maximumf %5, %6 : vector<16x128xf32>
    %cst_4 = arith.constant 0.000000e+00 : f32
    %8 = vector.broadcast %cst_4 : f32 to vector<16x128xf32>
    %9 = arith.subf %8, %3 : vector<16x128xf32>
    %10 = math.log1p %9 : vector<16x128xf32>
    %cst_5 = arith.constant -1.000000e+02 : f32
    %11 = vector.broadcast %cst_5 : f32 to vector<16x128xf32>
    %12 = arith.maximumf %10, %11 : vector<16x128xf32>
    %13 = arith.subf %7, %12 : vector<16x128xf32>
    %14 = arith.mulf %4, %13 : vector<16x128xf32>
    %15 = arith.addf %12, %14 : vector<16x128xf32>
    %cst_6 = arith.constant 0.000000e+00 : f32
    %16 = vector.broadcast %cst_6 : f32 to vector<16x128xf32>
    %17 = arith.subf %16, %15 : vector<16x128xf32>
    %c0_7 = arith.constant 0 : index
    %c0_8 = arith.constant 0 : index
    %18 = vector.load %arg4[%c0_7, %c0_8] : memref<8x128xf32, #tpu.memory_space<vmem>>, vector<8x128xf32>
    %19 = vector.shape_cast %17 : vector<16x128xf32> to vector<2x8x128xf32>
    %cst_9 = arith.constant dense<0.000000e+00> : vector<8x128xf32>
    %20 = vector.multi_reduction <add>, %19, %cst_9 [0] : vector<2x8x128xf32> to vector<8x128xf32>
    %21 = arith.addf %18, %20 : vector<8x128xf32>
    %c0_10 = arith.constant 0 : index
    %c0_11 = arith.constant 0 : index
    %22 = vector.load %arg4[%c0_10, %c0_11] : memref<8x128xf32, #tpu.memory_space<vmem>>, vector<8x128xf32>
    tpu.vector_store %arg4[%c0_10, %c0_11], %21 {strides = array<i32>} : memref<8x128xf32, #tpu.memory_space<vmem>>, vector<8x128xf32>,
    return
  }
  func.func @transform_0(%arg0: i32, %arg1: i32) -> (i32, i32) {
    %c1_i32 = arith.constant 1 : i32
    %0 = arith.muli %arg0, %c1_i32 : i32
    %1 = arith.addi %0, %arg1 : i32
    %c0_i32 = arith.constant 0 : i32
    %2 = arith.minsi %1, %c0_i32 : i32
    %c0_i32_0 = arith.constant 0 : i32
    %c0_i32_1 = arith.constant 0 : i32
    return %2, %c0_i32_0 : i32, i32
  }
  func.func @transform_1(%arg0: i32, %arg1: i32) -> (i32, i32) {
    %c1_i32 = arith.constant 1 : i32
    %0 = arith.muli %arg0, %c1_i32 : i32
    %1 = arith.addi %0, %arg1 : i32
    %c0_i32 = arith.constant 0 : i32
    %2 = arith.minsi %1, %c0_i32 : i32
    %c0_i32_0 = arith.constant 0 : i32
    %c0_i32_1 = arith.constant 0 : i32
    return %2, %c0_i32_0 : i32, i32
  }
  func.func @transform_2(%arg0: i32, %arg1: i32) -> (i32, i32) {
    %c0_i32 = arith.constant 0 : i32
    %c0_i32_0 = arith.constant 0 : i32
    return %arg0, %c0_i32 : i32, i32
  }
}

</mosaic_0001>

<bundles_post_ra>
// kernel: tpu_custom_call.1
= control target key start
LH: loop header
LB: loop body
LE: loop exit
PB: predicated region body
PF: predicated region fallthrough
CT: control target
= control target key end

     0   :  { %7 = vsyncpa [#allocation3], 0  ;;  %s271_s0 = inlined_call_operand.hbm [shape: f32[16,128], index: 0, kind: input, shape index: {}]   ;;  %s272_s1 = inlined_call_operand.hbm [shape: f32[16,128], index: 1, kind: input, shape index: {}]   ;;  %s273_s2 = inlined_call_operand.hbm [shape: f32[8,128], index: 2, kind: output, shape index: {}]  }
   0x1   :  { %8 = vsyncpa [#allocation6], 0 }
   0x2   :  { %9 = vsyncpa [#allocation4], 0  ;;  %s215_s9 = smov [#allocation2]   ;;  %s143_s13 = scalar_lea.hbm %s271_s0, 256 }
   0x3   :  { %s21_s10 = sshll.u32 %s215_s9, 4  ;;  %p144_p0 = scmp.ne.s32.totalorder %s271_s0, %s143_s13  ;;  %s22_s10 = int_to_ptr.vmem [resolvable:$true] %s21_s10 }
   0x4   :  { %p147_p1 = scmp.lt.u32.totalorder %s143_s13, %s271_s0 }
   0x6   :  { %p149_p2 = pnand %p147_p1, %p144_p0 }
   0x8   :  { %152 = shalt.err (!%p149_p2)
}
   0x9   :  { %s153_s18 = scalar_lea.vmem %s22_s10, 256  ;;  %p158_p4 = scmp.lt.s32.totalorder %s22_s10, %s22_s10 }
   0xa   :  { %p154_p3 = scmp.ne.s32.totalorder %s22_s10, %s153_s18  ;;  %p159_p5 = scmp.lt.s32.totalorder %s153_s18, %s153_s18 }
   0xc   :  { %p160_p6 = por %p159_p5, %p158_p4 }
   0xe   :  { %p161_p7 = pnand %p160_p6, %p154_p3 }
  0x10   :  { %164 = shalt.err (!%p161_p7)
}
  0x11   :  { %s216_s19 = smov 128   ;;  %s217_s20 = smov 8  }
  0x12   :  { %27 = dma.hbm_to_vmem [thread:$0]  %s271_s0, 256, %s22_s10, [#allocation3], %s216_s19, %s216_s19, %s217_s20  }
  0x13   :  { %s218_s23 = smov [#allocation5]   ;;  %s165_s27 = scalar_lea.hbm %s272_s1, 256 }
  0x14   :  { %s39_s24 = sshll.u32 %s218_s23, 4  ;;  %p166_p8 = scmp.ne.s32.totalorder %s272_s1, %s165_s27  ;;  %s40_s24 = int_to_ptr.vmem [resolvable:$true] %s39_s24 }
  0x15   :  { %p169_p9 = scmp.lt.u32.totalorder %s165_s27, %s272_s1 }
  0x17   :  { %p171_p10 = pnand %p169_p9, %p166_p8 }
  0x19   :  { %174 = shalt.err (!%p171_p10)
}
  0x1a   :  { %s175_s4 = scalar_lea.vmem %s40_s24, 256  ;;  %p180_p12 = scmp.lt.s32.totalorder %s40_s24, %s40_s24 }
  0x1b   :  { %p176_p11 = scmp.ne.s32.totalorder %s40_s24, %s175_s4  ;;  %p181_p13 = scmp.lt.s32.totalorder %s175_s4, %s175_s4 }
  0x1d   :  { %p182_p0 = por %p181_p13, %p180_p12 }
  0x1f   :  { %p183_p1 = pnand %p182_p0, %p176_p11 }
  0x21   :  { %186 = shalt.err (!%p183_p1)
}
  0x22   :  { %45 = dma.hbm_to_vmem [thread:$0]  %s272_s1, 256, %s40_s24, [#allocation6], %s216_s19, %s216_s19, %s217_s20  }
  0x23   :  { %209 = dma.done.wait [#allocation3], 256  }
  0x24   :  { %210 = vsyncadd [#allocation3], 4294967040 }
  0x25   :  { %211 = dma.done.wait [#allocation6], 256  }
  0x26   :  { %212 = vsyncadd [#allocation6], 4294967040  ;;  %v65_v0 = vld [vmem:[#allocation2] sm:$0xff]  ;;  %v66_v1 = vld [vmem:[#allocation2 + $0x8] sm:$0xff]  ;;  %s219_s1 = smov [#allocation7]  }
  0x27   :  { %135 = vlog2.f32 %v65_v0  ;;  %v75_v2 = vsub.f32 0.0, %v65_v0  ;;  %v76_v3 = vsub.f32 0.0, %v66_v1  ;;  %v67_v27 = vld [vmem:[#allocation5] sm:$0xff]  ;;  %v68_v29 = vld [vmem:[#allocation5 + $0x8] sm:$0xff]  ;;  %s115_s6 = sshll.u32 %s219_s1, 4  ;;  %s116_s6 = int_to_ptr.vmem [resolvable:$true] %s115_s6 }
  0x28   :  { %137 = vlog2.f32 %v66_v1  ;;  %s187_s7 = scalar_lea.vmem %s116_s6, 128  ;;  %p192_p3 = scmp.lt.s32.totalorder %s116_s6, %s116_s6 }
  0x29   :  { %v77_v4 = vadd.f32 1.0, %v75_v2  ;;  %v86_v5 = vadd.f32 1.0, %v76_v3  ;;  %v80_v6 = vmul.f32 -0.5, %v75_v2  ;;  %v89_v7 = vmul.f32 -0.5, %v76_v3  ;;  %p188_p2 = scmp.ne.s32.totalorder %s116_s6, %s187_s7  ;;  %p193_p4 = scmp.lt.s32.totalorder %s187_s7, %s187_s7 }
  0x2a   :  { %v83_v10 = vand.u32 2147483647, %v75_v2  ;;  %v92_v13 = vand.u32 2147483647, %v76_v3 }
  0x2b   :  { %139 = vlog2.f32 %v77_v4  ;;  %v81_v8 = vadd.f32 1.0, %v80_v6  ;;  %v90_v11 = vadd.f32 1.0, %v89_v7  ;;  %p194_p5 = por %p193_p4, %p192_p3 }
  0x2c   :  { %141 = vlog2.f32 %v86_v5  ;;  %vm84_vm0 = vcmp.lt.f32.partialorder %v83_v10, 0.0004427343  ;;  %vm93_vm1 = vcmp.lt.f32.partialorder %v92_v13, 0.0004427343 }
  0x2d   :  { %v82_v16 = vmul.f32 %v81_v8, %v75_v2  ;;  %v91_v18 = vmul.f32 %v90_v11, %v76_v3  ;;  %p195_p6 = pnand %p194_p5, %p188_p2 }
  0x31   :  { %v136_v9 = vpop.eup %135 }
  0x32   :  { %v138_v12 = vpop.eup %137  ;;  %v70_v14 = vmul.f32 0.6931472, %v136_v9 }
  0x33   :  { %v72_v15 = vmul.f32 0.6931472, %v138_v12 }
  0x34   :  { %v73_v21 = vmax.f32 %v70_v14, -100.0 }
  0x35   :  { %v140_v17 = vpop.eup %139  ;;  %v74_v23 = vmax.f32 %v72_v15, -100.0 }
  0x36   :  { %v142_v19 = vpop.eup %141  ;;  %v79_v20 = vmul.f32 0.6931472, %v140_v17 }
  0x37   :  { %v88_v22 = vmul.f32 0.6931472, %v142_v19 }
  0x38   :  { %v85_v24 = vsel %vm84_vm0, %v82_v16, %v79_v20 }
  0x39   :  { %v94_v25 = vsel %vm93_vm1, %v91_v18, %v88_v22  ;;  %v95_v26 = vmax.f32 %v85_v24, -100.0 }
  0x3a   :  { %v96_v28 = vmax.f32 %v94_v25, -100.0 }
  0x3b   :  { %v97_v30 = vsub.f32 %v73_v21, %v95_v26 }
  0x3c   :  { %v98_v31 = vsub.f32 %v74_v23, %v96_v28 }
  0x3d   :  { %v99_v32 = vmul.f32 %v97_v30, %v67_v27 }
  0x3e   :  { %v100_v33 = vmul.f32 %v98_v31, %v68_v29 }
  0x3f   :  { %v101_v34 = vadd.f32 %v99_v32, %v95_v26 }
  0x40   :  { %v102_v35 = vadd.f32 %v100_v33, %v96_v28 }
  0x41   :  { %v103_v36 = vsub.f32 0.0, %v101_v34 }
  0x42   :  { %v104_v37 = vsub.f32 0.0, %v102_v35 }
  0x44   :  { %v106_v38 = vadd.f32 %v104_v37, %v103_v36 }
  0x46   :  { %108 = vst [vmem:[#allocation7] sm:$0xff] %v106_v38 }
  0x47   :  { %198 = shalt.err (!%p195_p6)
}
  0x48   :  { %s199_s10 = scalar_lea.hbm %s273_s2, 128 }
  0x49   :  { %p200_p7 = scmp.ne.s32.totalorder %s273_s2, %s199_s10  ;;  %p203_p8 = scmp.lt.u32.totalorder %s199_s10, %s273_s2 }
  0x4b   :  { %p205_p9 = pnand %p203_p8, %p200_p7 }
  0x4d   :  { %208 = shalt.err (!%p205_p9)
}
  0x4e   :  { %118 = dma.vmem_to_hbm [thread:$0]  %s116_s6, 128, %s273_s2, [#allocation4]  }
  0x4f   :  { %213 = dma.done.wait [#allocation4], 128  }
  0x50   :  { %214 = vsyncadd [#allocation4], 4294967168 }
  0x51   :  { %122 = vsyncpa [#allocation3], 1 }
  0x52   :  { %123 = vsyncpa [#allocation6], 1 }
  0x53   :  { %124 = vsyncpa [#allocation4], 1 }

</bundles_post_ra>
